<compile_context>
chip_gen: v7x
topology: tpu7x:2x2x1
jax: 0.10.0
libtpu: 0.0.40
codegen_flags: <defaults>
</compile_context>

<pallas_src>
import functools
import math

import jax
import jax.numpy as jnp
from jax.experimental import pallas as pl
from jax.experimental.pallas import tpu as pltpu


def build_positional_encoding(d_model: int, max_len: int = 512, dtype=jnp.float32) -> jnp.ndarray:
    """Sinusoidal PE table, shape (max_len, d_model), pre-cast once to `dtype`.

    Same values as the PyTorch register_buffer (max_len, 1, d_model); the broadcast
    axis is re-introduced by the kernel instead of being stored.
    """
    position = jnp.arange(max_len, dtype=jnp.float32)[:, None]                     # (max_len, 1)
    div_term = jnp.exp(
        jnp.arange(0, d_model, 2, dtype=jnp.float32) * (-math.log(10000.0) / d_model)
    )                                                                               # (d_model//2,)
    pe = jnp.zeros((max_len, d_model), dtype=jnp.float32)
    pe = pe.at[:, 0::2].set(jnp.sin(position * div_term))
    pe = pe.at[:, 1::2].set(jnp.cos(position * div_term))
    return pe.astype(dtype)


def _pe_add_flat_kernel(x_ref, pe_ref, o_ref, *, batch: int):
    # x_ref/o_ref: (TS, B*D) contiguous, lane-dense slab; pe_ref: (TS, D).
    # Replicate pe along lanes so column b*D + d gets pe[:, d] (== broadcast over batch).
    pe = pe_ref[...]
    pe_wide = pe if batch == 1 else jnp.concatenate([pe] * batch, axis=1)
    o_ref[...] = (x_ref[...] + pe_wide).astype(o_ref.dtype)


def _pe_add_3d_kernel(x_ref, pe_ref, o_ref):
    # x_ref/o_ref: (TS, B, D) with D % 128 == 0, B >= 8; pe_ref: (TS, D).
    # Sublane broadcast of pe over the batch axis.
    o_ref[...] = (x_ref[...] + pe_ref[...][:, None, :]).astype(o_ref.dtype)


def _pick_seq_tile(S: int, row_bytes: int, target_bytes: int = 3 << 20) -> int:
    """Seq rows per tile: ~target_bytes of x per tile, multiple of 8 sublanes, clamped so
    the grid keeps >= 2 steps when S allows (v7x has 2 TensorCores to feed)."""
    if S <= 8:
        return S
    rows = max(8, (target_bytes // max(1, row_bytes)) // 8 * 8)
    rows = min(rows, max(8, (S // 2) // 8 * 8))     # guarantee >= 2 grid steps
    return rows


def positional_encoding_forward(x: jnp.ndarray, pe: jnp.ndarray) -> jnp.ndarray:
    """x: (S, B, D); pe: (max_len, D) from build_positional_encoding.

    Returns x + pe[:S, None, :] (same semantics as the PyTorch forward)."""
    S, B, D = x.shape
    max_len, d_pe = pe.shape
    assert S <= max_len, f"sequence length {S} exceeds max_len {max_len}"
    assert d_pe == D, f"pe feature dim {d_pe} != x feature dim {D}"

    if pe.dtype != x.dtype:       # normally a no-op: buffer is pre-built in the model dtype
        pe = pe.astype(x.dtype)

    itemsize = jnp.dtype(x.dtype).itemsize
    TS = _pick_seq_tile(S, B * D * itemsize)
    grid = (pl.cdiv(S, TS),)

    if TS % 8 == 0:
        # Tile the full pe buffer directly via BlockSpec: no per-call slice op, and pe is
        # DMA'd exactly once per seq tile.
        pe_arg = pe
        pe_spec = pl.BlockSpec((TS, D), lambda s: (s, 0))
    else:
        # Rare small/ragged-S path (TS == S, S not a multiple of 8): full-extent blocks are
        # only layout-legal when they equal the array dims, so slice pe to (S, D).
        pe_arg = jax.lax.slice(pe, (0, 0), (S, D))
        pe_spec = pl.BlockSpec((S, D), lambda s: (0, 0))

    cparams = pltpu.CompilerParams(
        dimension_semantics=("parallel",),      # seq tiles are independent -> v7x megacore
        vmem_limit_bytes=32 * 1024 * 1024,      # > v5e's 16 MiB default, < v7x's 64 MiB physical
    )

    if D % 128 == 0 and B >= 8:
        # Already lane-dense and no sublane padding: keep the natural 3-D block.
        return pl.pallas_call(
            _pe_add_3d_kernel,
            out_shape=jax.ShapeDtypeStruct((S, B, D), x.dtype),
            grid_spec=pltpu.PrefetchScalarGridSpec(
                num_scalar_prefetch=0,
                grid=grid,
                in_specs=[
                    pl.BlockSpec((TS, B, D), lambda s: (s, 0, 0)),
                    pe_spec,
                ],
                out_specs=pl.BlockSpec((TS, B, D), lambda s: (s, 0, 0)),
            ),
            compiler_params=cparams,
        )(x, pe_arg)

    # General path (D < 128 and/or small B): flatten batch into lanes so every x/out DMA is
    # one contiguous strip and the stores are as lane-dense as the problem allows.
    x_flat = x.reshape(S, B * D)    # free metadata reshape of the contiguous (S, B, D) array
    out_flat = pl.pallas_call(
        functools.partial(_pe_add_flat_kernel, batch=B),
        out_shape=jax.ShapeDtypeStruct((S, B * D), x.dtype),
        grid_spec=pltpu.PrefetchScalarGridSpec(
            num_scalar_prefetch=0,
            grid=grid,
            in_specs=[
                pl.BlockSpec((TS, B * D), lambda s: (s, 0)),
                pe_spec,
            ],
            out_specs=pl.BlockSpec((TS, B * D), lambda s: (s, 0)),
        ),
        compiler_params=cparams,
    )(x_flat, pe_arg)
    return out_flat.reshape(S, B, D)


if __name__ == "__main__":
    # Shapes implied by the module: seq-first (S, B, d_model).
    seq_len, batch, d_model, max_len = 8, 2, 32, 512

    key = jax.random.PRNGKey(0)
    x = jax.random.normal(key, (seq_len, batch, d_model), dtype=jnp.float32)
    pe = build_positional_encoding(d_model, max_len, dtype=x.dtype)

    out = jax.block_until_ready(positional_encoding_forward(x, pe))
    ref = x + pe[:seq_len][:, None, :]
    assert out.shape == (seq_len, batch, d_model)
    assert jnp.allclose(out, ref, atol=1e-6), "mismatch vs reference (flat path)"

    # Also exercise the D % 128 == 0 / B >= 8 (3-D block) path with a small shape.
    x2 = jax.random.normal(jax.random.PRNGKey(0), (16, 8, 128), dtype=jnp.float32)
    pe2 = build_positional_encoding(128, max_len, dtype=x2.dtype)
    out2 = jax.block_until_ready(positional_encoding_forward(x2, pe2))
    ref2 = x2 + pe2[:16][:, None, :]
    assert jnp.allclose(out2, ref2, atol=1e-6), "mismatch vs reference (3-D path)"

    print("KERNEL_OK")
</pallas_src>

<mosaic_0001>
module attributes {stable_mosaic.version = 11 : i64} {
  func.func @_pe_add_flat_kernel(%arg0: i32, %arg1: memref<8x64xf32, #tpu.memory_space<vmem>>, %arg2: memref<8x32xf32, #tpu.memory_space<vmem>>, %arg3: memref<8x64xf32, #tpu.memory_space<vmem>>) attributes {dimension_semantics = [#tpu.dimension_semantics<parallel>], iteration_bounds = array<i64: 1>, scalar_prefetch = 0 : i64, scratch_operands = 0 : i64, tpu.core_type = #tpu.core_type<tc>, window_params = [{transform_indices = @transform_0, window_bounds = array<i64: 8, 64>}, {transform_indices = @transform_1, window_bounds = array<i64: 8, 32>}, {transform_indices = @transform_2, window_bounds = array<i64: 8, 64>}]} {
    %c0 = arith.constant 0 : index
    %c0_0 = arith.constant 0 : index
    %0 = vector.load %arg2[%c0, %c0_0] : memref<8x32xf32, #tpu.memory_space<vmem>>, vector<8x32xf32>
    %1 = tpu.concatenate %0, %0 in 1 : vector<8x32xf32>, vector<8x32xf32> -> vector<8x64xf32>
    %c0_1 = arith.constant 0 : index
    %c0_2 = arith.constant 0 : index
    %2 = vector.load %arg1[%c0_1, %c0_2] : memref<8x64xf32, #tpu.memory_space<vmem>>, vector<8x64xf32>
    %3 = arith.addf %2, %1 : vector<8x64xf32>
    %c0_3 = arith.constant 0 : index
    %c0_4 = arith.constant 0 : index
    %4 = vector.load %arg3[%c0_3, %c0_4] : memref<8x64xf32, #tpu.memory_space<vmem>>, vector<8x64xf32>
    tpu.vector_store %arg3[%c0_3, %c0_4], %3 {strides = array<i32>} : memref<8x64xf32, #tpu.memory_space<vmem>>, vector<8x64xf32>,
    return
  }
  func.func @transform_0(%arg0: i32) -> (i32, i32) {
    %c0_i32 = arith.constant 0 : i32
    %c0_i32_0 = arith.constant 0 : i32
    return %arg0, %c0_i32 : i32, i32
  }
  func.func @transform_1(%arg0: i32) -> (i32, i32) {
    %c0_i32 = arith.constant 0 : i32
    %c0_i32_0 = arith.constant 0 : i32
    return %arg0, %c0_i32 : i32, i32
  }
  func.func @transform_2(%arg0: i32) -> (i32, i32) {
    %c0_i32 = arith.constant 0 : i32
    %c0_i32_0 = arith.constant 0 : i32
    return %arg0, %c0_i32 : i32, i32
  }
}

</mosaic_0001>

<bundles_post_ra>
// kernel: tpu_custom_call.1
= control target key start
LH: loop header
LB: loop body
LE: loop exit
PB: predicated region body
PF: predicated region fallthrough
CT: control target
= control target key end

     0   :  { %s98_s0 = inlined_call_operand.vmem [shape: f32[8,64], index: 0, kind: input, shape index: {}]   ;;  %s99_s1 = inlined_call_operand.vmem [shape: f32[512,32], index: 1, kind: input, shape index: {}]   ;;  %s100_s2 = inlined_call_operand.hbm [shape: f32[8,64], index: 2, kind: output, shape index: {}]  }
   0x1   :  { %v12_v0 = vld [vmem:[%s99_s1] sm:$0xff] }
   0x2   :  { %7 = vsyncpa [#allocation3], 0  ;;  %s63_s11 = smov 32   ;;  %vm17_vm0 = vcmask 261120   ;;  %v19_v1 = vld [vmem:[%s98_s0] sm:$0xff]  ;;  %s64_s14 = smov [#allocation2]  }
   0x3   :  { %14 = vrot.lane.b32.xlu0 %v12_v0, %s63_s11  ;;  %s29_s15 = sshll.u32 %s64_s14, 4  ;;  %vm21_vm1 = vcmask 523264   ;;  %s30_s15 = int_to_ptr.vmem [resolvable:$true] %s29_s15 }
   0x4   :  { %s39_s16 = scalar_lea.vmem %s30_s15, 128  ;;  %p44_p1 = scmp.lt.s32.totalorder %s30_s15, %s30_s15 }
   0x5   :  { %p40_p0 = scmp.ne.s32.totalorder %s30_s15, %s39_s16  ;;  %p45_p2 = scmp.lt.s32.totalorder %s39_s16, %s39_s16 }
   0x7   :  { %p46_p3 = por %p45_p2, %p44_p1 }
   0x9   :  { %p47_p4 = pnand %p46_p3, %p40_p0 }
  0x75   :  { %v15_v2 = vpop.permute.xlu0 %14 }
  0x76   :  { %v18_v3 = vsel %vm17_vm0, %v12_v0, %v15_v2 }
  0x77   :  { %v20_v4 = vadd.f32 %v19_v1, %v18_v3 }
  0x79   :  { %22 = vst.msk [vmem:[#allocation2] sm:$0xff] %vm21_vm1, %v20_v4 }
  0x7a   :  { %50 = shalt.err (!%p47_p4)
}
  0x7b   :  { %s51_s18 = scalar_lea.hbm %s100_s2, 128 }
  0x7c   :  { %p52_p5 = scmp.ne.s32.totalorder %s100_s2, %s51_s18  ;;  %p55_p6 = scmp.lt.u32.totalorder %s51_s18, %s100_s2 }
  0x7e   :  { %p57_p7 = pnand %p55_p6, %p52_p5 }
  0x80   :  { %60 = shalt.err (!%p57_p7)
}
  0x81   :  { %32 = dma.vmem_to_hbm [thread:$0]  %s30_s15, 128, %s100_s2, [#allocation3]  }
  0x82   :  { %61 = dma.done.wait [#allocation3], 128  }
  0x83   :  { %62 = vsyncadd [#allocation3], 4294967168 }
  0x84   :  { %36 = vsyncpa [#allocation3], 1 }

</bundles_post_ra>
